<compile_context>
chip_gen: v7x
topology: tpu7x:2x2x1
jax: 0.10.0
libtpu: 0.0.40
codegen_flags: <defaults>
</compile_context>

<pallas_src>
import functools
import math

import jax
import jax.numpy as jnp
from jax.experimental import pallas as pl
from jax.experimental.pallas import tpu as pltpu

_VMEM_LIMIT = 64 * 1024 * 1024


def _round_up(x, m):
    return (x + m - 1) // m * m


def _layernorm(y, inv_h, eps):
    # One-pass mean / variance: E[y^2] - mean^2 (clamped). Padded lanes of y are exactly zero
    # (zero-padded weight columns + bias), so the sums only see the real H channels.
    s1 = jnp.sum(y, axis=-1, keepdims=True)
    s2 = jnp.sum(y * y, axis=-1, keepdims=True)
    mean = s1 * inv_h
    var = jnp.maximum(s2 * inv_h - mean * mean, 0.0)
    return (y - mean) * jax.lax.rsqrt(var + eps)


# rows of the packed per-channel parameter block [8, Hp]
_BIAS, _GAMMA, _BETA, _RP_M1, _RP_A, _RP_M2, _LS_A, _LS_M = range(8)


def _qkv_proj_kernel(eps, inv_h, Hp, x_ref, wt_ref, p_ref, mq_ref, mk_ref, mv_ref):
    """Fused q/k/v projection for one row tile.

    mixed_{q,k,v} = RPReLU(LayerNorm(x @ W^T + b') + x); `move` is folded into b'.
    One [TM,Hp]x[Hp,3*Hp] MXU matmul serves all three projections; x is loaded once.
    """
    x = x_ref[...]                                           # [TM, Hp] f32
    y = jnp.dot(x.astype(jnp.bfloat16), wt_ref[...],         # bf16 MXU inputs, f32 accumulation
                preferred_element_type=jnp.float32)          # [TM, 3*Hp]
    for j, o_ref in enumerate((mq_ref, mk_ref, mv_ref)):
        p = p_ref[j]                                         # [8, Hp] packed per-channel params
        yj = y[:, j * Hp:(j + 1) * Hp] + p[_BIAS:_BIAS + 1]  # lane-tile aligned slice (Hp % 128 == 0)
        ln = _layernorm(yj, inv_h, eps) * p[_GAMMA:_GAMMA + 1] + p[_BETA:_BETA + 1]
        out = ln + x
        t = out - p[_RP_M1:_RP_M1 + 1]
        rp = jnp.where(t > 0, t, p[_RP_A:_RP_A + 1] * t) + p[_RP_M2:_RP_M2 + 1]
        o_ref[...] = rp.astype(o_ref.dtype)


def _attention_kernel(scale, q_ref, k_ref, v_ref, mq2_ref, mk2_ref, mv2_ref, o_ref):
    """Per (batch, q-tile), all heads at once: softmax((q+mq2)(k+mk2)^T / sqrt(Dh)) @ (v+mv2)."""
    q = (q_ref[0] + mq2_ref[...]).astype(jnp.bfloat16)       # [nh, TQ, Dh]
    k = (k_ref[0] + mk2_ref[...]).astype(jnp.bfloat16)       # [nh, S,  Dh]
    v = (v_ref[0] + mv2_ref[...]).astype(jnp.bfloat16)       # [nh, S,  Dh]
    s = jnp.einsum("hqd,hkd->hqk", q, k,
                   preferred_element_type=jnp.float32) * scale          # [nh, TQ, S]
    s = s - jnp.max(s, axis=-1, keepdims=True)
    e = jnp.exp(s)
    probs = e * pl.reciprocal(jnp.sum(e, axis=-1, keepdims=True), approx=True)
    ctx = jnp.einsum("hqk,hkd->hqd", probs.astype(jnp.bfloat16), v,
                     preferred_element_type=jnp.float32)                # [nh, TQ, Dh]
    o_ref[...] = ctx[None].astype(o_ref.dtype)


def _ctx_output_kernel(eps, inv_h, ctx_ref, mq_ref, mk_ref, mv_ref,
                       wt_ref, pc_ref, po_ref, o_ref):
    """Fused: norm_context + (mq+mk+mv) residual + rprelu_context, then ViTSelfOutput."""
    pc = pc_ref[...]                                         # rows: gamma, beta, m1, a, m2, 0, 0, 0
    po = po_ref[...]                                         # packed like _qkv_proj_kernel
    c = ctx_ref[...]                                         # [TM, Hp] f32

    ln_c = _layernorm(c, inv_h, eps) * pc[0:1] + pc[1:2]
    h = ln_c + mq_ref[...] + mk_ref[...] + mv_ref[...]
    t = h - pc[2:3]
    h = jnp.where(t > 0, t, pc[3:4] * t) + pc[4:5]

    # ViTSelfOutput: dense (move folded into bias) -> LN -> residual -> RPReLU -> LayerScale
    y = jnp.dot(h.astype(jnp.bfloat16), wt_ref[...],
                preferred_element_type=jnp.float32) + po[_BIAS:_BIAS + 1]
    ln = _layernorm(y, inv_h, eps) * po[_GAMMA:_GAMMA + 1] + po[_BETA:_BETA + 1]
    out = ln + h
    t2 = out - po[_RP_M1:_RP_M1 + 1]
    rp = jnp.where(t2 > 0, t2, po[_RP_A:_RP_A + 1] * t2) + po[_RP_M2:_RP_M2 + 1]
    o_ref[...] = (rp * po[_LS_A:_LS_A + 1] + po[_LS_M:_LS_M + 1]).astype(o_ref.dtype)


def prepare_params(params, hidden_size, num_heads):
    """One-time host-side prep: pad to lane-dense Hp, fold move into bias, pack per-channel
    vectors into [8, Hp] blocks, concatenate + pre-transpose + bf16-cast the q/k/v weights."""
    H = hidden_size
    Hp = max(128, _round_up(H, 128))
    Dh = H // num_heads

    def pad_vec(v):
        return jnp.pad(v.astype(jnp.float32), (0, Hp - H))

    def pad_wt(w):   # torch weight [out, in] -> padded W^T [Hp(in), Hp(out)], bf16
        return jnp.pad(w.T.astype(jnp.float32),
                       ((0, Hp - H), (0, Hp - H))).astype(jnp.bfloat16)

    ones = jnp.ones((H,), jnp.float32)
    zeros = jnp.zeros((H,), jnp.float32)

    def pack(move, w, b, gamma, beta, m1, a, m2, ls_alpha, ls_move):
        b_fold = move @ w.T + b          # (x + move) @ W^T + b == x @ W^T + b_fold
        return jnp.stack([pad_vec(b_fold), pad_vec(gamma), pad_vec(beta),
                          pad_vec(m1), pad_vec(a), pad_vec(m2),
                          pad_vec(ls_alpha), pad_vec(ls_move)])

    prep = {"Hp": Hp}
    wts, packs = [], []
    for nm in ("q", "k", "v"):
        wts.append(pad_wt(params[f"w{nm}"]))
        packs.append(pack(params[f"move{nm}"], params[f"w{nm}"], params[f"b{nm}"],
                          params[f"norm{nm}_g"], params[f"norm{nm}_b"],
                          params[f"rp{nm}_m1"], params[f"rp{nm}_a"], params[f"rp{nm}_m2"],
                          ones, zeros))   # no LayerScale on the q/k/v branches
        prep[f"m{nm}2"] = params[f"move{nm}2"].astype(jnp.float32).reshape(num_heads, 1, Dh)
    prep["WT_qkv"] = jnp.concatenate(wts, axis=1)            # [Hp, 3*Hp] bf16
    prep["P_qkv"] = jnp.stack(packs)                          # [3, 8, Hp] f32
    prep["WT_o"] = pad_wt(params["wo"])
    prep["P_o"] = pack(params["move_o"], params["wo"], params["bo"],
                       params["normo_g"], params["normo_b"],
                       params["rpo_m1"], params["rpo_a"], params["rpo_m2"],
                       params["ls_alpha"], params["ls_move"])
    prep["PC"] = jnp.stack([pad_vec(params["normc_g"]), pad_vec(params["normc_b"]),
                            pad_vec(params["rpc_m1"]), pad_vec(params["rpc_a"]),
                            pad_vec(params["rpc_m2"]),
                            pad_vec(zeros), pad_vec(zeros), pad_vec(zeros)])
    return prep


def vit_attention_forward(x, prep, *, num_heads, eps=1e-6):
    """x: [B, S, H] float32. prep: output of prepare_params."""
    B, S, H = x.shape
    Hp = prep["Hp"]
    Dh = H // num_heads
    M = B * S
    TM = 512 if M >= 512 else _round_up(M, 8)
    Mp = _round_up(M, TM)
    inv_h = 1.0 / float(H)

    xp = jnp.pad(x.reshape(M, H).astype(jnp.float32), ((0, Mp - M), (0, Hp - H)))

    # fused mixed q / k / v layers (one dense + per-branch LN + residual + RPReLU), row-tiled
    proj_out = jax.ShapeDtypeStruct((Mp, Hp), jnp.float32)
    row_spec = pl.BlockSpec((TM, Hp), lambda i: (i, 0))
    mq, mk, mv = pl.pallas_call(
        functools.partial(_qkv_proj_kernel, eps, inv_h, Hp),
        out_shape=(proj_out, proj_out, proj_out),
        grid_spec=pltpu.PrefetchScalarGridSpec(
            num_scalar_prefetch=0,
            grid=(Mp // TM,),
            in_specs=[
                row_spec,                                          # activations (row tile)
                pl.BlockSpec((Hp, 3 * Hp), lambda i: (0, 0)),      # [Wq|Wk|Wv]^T (bf16), resident
                pl.BlockSpec((3, 8, Hp), lambda i: (0, 0, 0)),     # packed per-channel params
            ],
            out_specs=[row_spec, row_spec, row_spec],
        ),
        compiler_params=pltpu.CompilerParams(
            dimension_semantics=("parallel",),
            vmem_limit_bytes=_VMEM_LIMIT),
    )(xp, prep["WT_qkv"], prep["P_qkv"])

    def to_heads(m):
        return m[:M, :H].reshape(B, S, num_heads, Dh).transpose(0, 2, 1, 3)

    q4, k4, v4 = to_heads(mq), to_heads(mk), to_heads(mv)

    TQ = S
    for cand in (512, 256, 128):
        if S % cand == 0:
            TQ = cand
            break
    scale = 1.0 / math.sqrt(Dh)

    ctx4 = pl.pallas_call(
        functools.partial(_attention_kernel, scale),
        out_shape=jax.ShapeDtypeStruct((B, num_heads, S, Dh), jnp.float32),
        grid_spec=pltpu.PrefetchScalarGridSpec(
            num_scalar_prefetch=0,
            grid=(B, S // TQ),
            in_specs=[
                pl.BlockSpec((1, num_heads, TQ, Dh), lambda b, qi: (b, 0, qi, 0)),
                pl.BlockSpec((1, num_heads, S, Dh), lambda b, qi: (b, 0, 0, 0)),
                pl.BlockSpec((1, num_heads, S, Dh), lambda b, qi: (b, 0, 0, 0)),
                pl.BlockSpec((num_heads, 1, Dh), lambda b, qi: (0, 0, 0)),
                pl.BlockSpec((num_heads, 1, Dh), lambda b, qi: (0, 0, 0)),
                pl.BlockSpec((num_heads, 1, Dh), lambda b, qi: (0, 0, 0)),
            ],
            out_specs=pl.BlockSpec((1, num_heads, TQ, Dh), lambda b, qi: (b, 0, qi, 0)),
        ),
        compiler_params=pltpu.CompilerParams(
            dimension_semantics=("parallel", "parallel"),
            vmem_limit_bytes=_VMEM_LIMIT),
    )(q4, k4, v4, prep["mq2"], prep["mk2"], prep["mv2"])

    ctx = ctx4.transpose(0, 2, 1, 3).reshape(M, H)
    ctx_p = jnp.pad(ctx, ((0, Mp - M), (0, Hp - H)))

    # fused context epilogue + ViTSelfOutput
    out_p = pl.pallas_call(
        functools.partial(_ctx_output_kernel, eps, inv_h),
        out_shape=jax.ShapeDtypeStruct((Mp, Hp), jnp.float32),
        grid_spec=pltpu.PrefetchScalarGridSpec(
            num_scalar_prefetch=0,
            grid=(Mp // TM,),
            in_specs=[
                row_spec,                                          # attention context
                row_spec,                                          # mixed q
                row_spec,                                          # mixed k
                row_spec,                                          # mixed v
                pl.BlockSpec((Hp, Hp), lambda i: (0, 0)),          # W_o^T (bf16), resident
                pl.BlockSpec((8, Hp), lambda i: (0, 0)),           # norm_context / rprelu_context
                pl.BlockSpec((8, Hp), lambda i: (0, 0)),           # self-output packed params
            ],
            out_specs=row_spec,
        ),
        compiler_params=pltpu.CompilerParams(
            dimension_semantics=("parallel",),
            vmem_limit_bytes=_VMEM_LIMIT),
    )(ctx_p, mq, mk, mv, prep["WT_o"], prep["PC"], prep["P_o"])

    return out_p[:M, :H].reshape(B, S, H)


def _reference(x, p, num_heads, eps):
    """Pure-JAX f32 reference of the PyTorch forward (eval mode, reduction_ratio == 1)."""
    B, S, H = x.shape
    Dh = H // num_heads

    def layernorm(v, g, b):
        m = jnp.mean(v, axis=-1, keepdims=True)
        var = jnp.mean((v - m) ** 2, axis=-1, keepdims=True)
        return (v - m) / jnp.sqrt(var + eps) * g + b

    def rprelu(v, m1, a, m2):
        t = v - m1
        return jnp.where(t > 0, t, a * t) + m2

    def linear(v, w, b):
        return jnp.einsum("bsh,oh->bso", v, w) + b

    mq = layernorm(linear(x + p["moveq"], p["wq"], p["bq"]), p["normq_g"], p["normq_b"]) + x
    mk = layernorm(linear(x + p["movek"], p["wk"], p["bk"]), p["normk_g"], p["normk_b"]) + x
    mv = layernorm(linear(x + p["movev"], p["wv"], p["bv"]), p["normv_g"], p["normv_b"]) + x
    mq = rprelu(mq, p["rpq_m1"], p["rpq_a"], p["rpq_m2"])
    mk = rprelu(mk, p["rpk_m1"], p["rpk_a"], p["rpk_m2"])
    mv = rprelu(mv, p["rpv_m1"], p["rpv_a"], p["rpv_m2"])
    q, k, v = mq + p["moveq2"], mk + p["movek2"], mv + p["movev2"]

    def heads(t):
        return t.reshape(B, S, num_heads, Dh).transpose(0, 2, 1, 3)

    qh, kh, vh = heads(q), heads(k), heads(v)
    scores = jnp.einsum("bhqd,bhkd->bhqk", qh, kh) / math.sqrt(Dh)
    probs = jax.nn.softmax(scores, axis=-1)
    ctx = jnp.einsum("bhqk,bhkd->bhqd", probs, vh).transpose(0, 2, 1, 3).reshape(B, S, H)

    ctx = layernorm(ctx, p["normc_g"], p["normc_b"]) + mq + mk + mv
    ctx = rprelu(ctx, p["rpc_m1"], p["rpc_a"], p["rpc_m2"])

    out = layernorm(linear(ctx + p["move_o"], p["wo"], p["bo"]), p["normo_g"], p["normo_b"]) + ctx
    out = rprelu(out, p["rpo_m1"], p["rpo_a"], p["rpo_m2"])
    return out * p["ls_alpha"] + p["ls_move"]


if __name__ == "__main__":
    key = jax.random.PRNGKey(0)
    B, S, H, num_heads = 2, 8, 32, 2
    keys = iter(jax.random.split(key, 64))

    def rnd(shape, scale=0.05):
        return scale * jax.random.normal(next(keys), shape, dtype=jnp.float32)

    x = jax.random.normal(next(keys), (B, S, H), dtype=jnp.float32)

    params = {}
    for nm in ("q", "k", "v"):
        params[f"move{nm}"] = rnd((H,))
        params[f"w{nm}"] = 0.02 * jax.random.normal(next(keys), (H, H), jnp.float32)
        params[f"b{nm}"] = rnd((H,), 0.01)
        params[f"norm{nm}_g"] = 1.0 + rnd((H,), 0.1)
        params[f"norm{nm}_b"] = rnd((H,))
        params[f"rp{nm}_m1"] = rnd((H,))
        params[f"rp{nm}_a"] = jnp.full((H,), 0.25, jnp.float32) + rnd((H,), 0.02)
        params[f"rp{nm}_m2"] = rnd((H,))
        params[f"move{nm}2"] = rnd((H,))
    params["normc_g"] = 1.0 + rnd((H,), 0.1)
    params["normc_b"] = rnd((H,))
    params["rpc_m1"] = rnd((H,))
    params["rpc_a"] = jnp.full((H,), 0.25, jnp.float32) + rnd((H,), 0.02)
    params["rpc_m2"] = rnd((H,))
    params["move_o"] = rnd((H,))
    params["wo"] = 0.02 * jax.random.normal(next(keys), (H, H), jnp.float32)
    params["bo"] = rnd((H,), 0.01)
    params["normo_g"] = 1.0 + rnd((H,), 0.1)
    params["normo_b"] = rnd((H,))
    params["rpo_m1"] = rnd((H,))
    params["rpo_a"] = jnp.full((H,), 0.25, jnp.float32) + rnd((H,), 0.02)
    params["rpo_m2"] = rnd((H,))
    params["ls_alpha"] = jnp.full((H,), 0.1, jnp.float32)
    params["ls_move"] = rnd((H,), 0.01)

    prep = prepare_params(params, H, num_heads)
    out = vit_attention_forward(x, prep, num_heads=num_heads, eps=1e-6)
    jax.block_until_ready(out)

    ref = _reference(x, params, num_heads, 1e-6)
    assert out.shape == (B, S, H)
    # bf16 MXU inputs (f32 accumulation) vs the pure-f32 reference -> relaxed tolerance
    assert jnp.allclose(out, ref, atol=5e-2, rtol=5e-2), "mismatch vs reference"

    print("KERNEL_OK")
</pallas_src>

<mosaic_0001>
module attributes {stable_mosaic.version = 11 : i64} {
  func.func @_qkv_proj_kernel(%arg0: i32, %arg1: memref<16x128xf32, #tpu.memory_space<vmem>>, %arg2: memref<128x384xbf16, #tpu.memory_space<vmem>>, %arg3: memref<3x8x128xf32, #tpu.memory_space<vmem>>, %arg4: memref<16x128xf32, #tpu.memory_space<vmem>>, %arg5: memref<16x128xf32, #tpu.memory_space<vmem>>, %arg6: memref<16x128xf32, #tpu.memory_space<vmem>>) attributes {dimension_semantics = [#tpu.dimension_semantics<parallel>], iteration_bounds = array<i64: 1>, scalar_prefetch = 0 : i64, scratch_operands = 0 : i64, tpu.core_type = #tpu.core_type<tc>, window_params = [{transform_indices = @transform_0, window_bounds = array<i64: 16, 128>}, {pipeline_mode = #tpu.pipeline_mode<synchronous>, transform_indices = @transform_1, window_bounds = array<i64: 128, 384>}, {pipeline_mode = #tpu.pipeline_mode<synchronous>, transform_indices = @transform_2, window_bounds = array<i64: 3, 8, 128>}, {transform_indices = @transform_3, window_bounds = array<i64: 16, 128>}, {transform_indices = @transform_4, window_bounds = array<i64: 16, 128>}, {transform_indices = @transform_5, window_bounds = array<i64: 16, 128>}]} {
    %c0 = arith.constant 0 : index
    %c0_0 = arith.constant 0 : index
    %0 = vector.load %arg1[%c0, %c0_0] : memref<16x128xf32, #tpu.memory_space<vmem>>, vector<16x128xf32>
    %1 = arith.truncf %0 : vector<16x128xf32> to vector<16x128xbf16>
    %c0_1 = arith.constant 0 : index
    %c0_2 = arith.constant 0 : index
    %2 = vector.load %arg2[%c0_1, %c0_2] : memref<128x384xbf16, #tpu.memory_space<vmem>>, vector<128x384xbf16>
    %cst = arith.constant dense<0.000000e+00> : vector<16x384xf32>
    %3 = tpu.matmul %1, %2, %cst {dimension_numbers = #tpu.dot_dimension_numbers<[1], [0], [0], [1], [0, 0, 1, 1], [], []>} : vector<16x128xbf16>, vector<128x384xbf16>, vector<16x384xf32> -> vector<16x384xf32>
    %c0_3 = arith.constant 0 : index
    %c0_4 = arith.constant 0 : index
    %c0_5 = arith.constant 0 : index
    %4 = vector.load %arg3[%c0_3, %c0_4, %c0_5] : memref<3x8x128xf32, #tpu.memory_space<vmem>>, vector<1x8x128xf32>
    %5 = vector.shape_cast %4 : vector<1x8x128xf32> to vector<8x128xf32>
    %6 = vector.extract_strided_slice %3 {offsets = [0, 0], sizes = [16, 128], strides = [1, 1]} : vector<16x384xf32> to vector<16x128xf32>
    %7 = vector.extract_strided_slice %5 {offsets = [0, 0], sizes = [1, 128], strides = [1, 1]} : vector<8x128xf32> to vector<1x128xf32>
    %8 = vector.broadcast %7 : vector<1x128xf32> to vector<16x128xf32>
    %9 = arith.addf %6, %8 : vector<16x128xf32>
    %cst_6 = arith.constant dense<0.000000e+00> : vector<16xf32>
    %10 = vector.multi_reduction <add>, %9, %cst_6 [1] : vector<16x128xf32> to vector<16xf32>
    %11 = vector.shape_cast %10 : vector<16xf32> to vector<16x1xf32>
    %12 = arith.mulf %9, %9 : vector<16x128xf32>
    %cst_7 = arith.constant dense<0.000000e+00> : vector<16xf32>
    %13 = vector.multi_reduction <add>, %12, %cst_7 [1] : vector<16x128xf32> to vector<16xf32>
    %14 = vector.shape_cast %13 : vector<16xf32> to vector<16x1xf32>
    %cst_8 = arith.constant 3.125000e-02 : f32
    %15 = vector.broadcast %cst_8 : f32 to vector<16x1xf32>
    %16 = arith.mulf %11, %15 : vector<16x1xf32>
    %cst_9 = arith.constant 3.125000e-02 : f32
    %17 = vector.broadcast %cst_9 : f32 to vector<16x1xf32>
    %18 = arith.mulf %14, %17 : vector<16x1xf32>
    %19 = arith.mulf %16, %16 : vector<16x1xf32>
    %20 = arith.subf %18, %19 : vector<16x1xf32>
    %cst_10 = arith.constant 0.000000e+00 : f32
    %21 = vector.broadcast %cst_10 : f32 to vector<16x1xf32>
    %22 = arith.maximumf %20, %21 : vector<16x1xf32>
    %23 = vector.broadcast %16 : vector<16x1xf32> to vector<16x128xf32>
    %24 = arith.subf %9, %23 : vector<16x128xf32>
    %cst_11 = arith.constant 9.99999997E-7 : f32
    %25 = vector.broadcast %cst_11 : f32 to vector<16x1xf32>
    %26 = arith.addf %22, %25 : vector<16x1xf32>
    %27 = math.rsqrt %26 : vector<16x1xf32>
    %28 = vector.broadcast %27 : vector<16x1xf32> to vector<16x128xf32>
    %29 = arith.mulf %24, %28 : vector<16x128xf32>
    %30 = vector.extract_strided_slice %5 {offsets = [1, 0], sizes = [1, 128], strides = [1, 1]} : vector<8x128xf32> to vector<1x128xf32>
    %31 = vector.broadcast %30 : vector<1x128xf32> to vector<16x128xf32>
    %32 = arith.mulf %29, %31 : vector<16x128xf32>
    %33 = vector.extract_strided_slice %5 {offsets = [2, 0], sizes = [1, 128], strides = [1, 1]} : vector<8x128xf32> to vector<1x128xf32>
    %34 = vector.broadcast %33 : vector<1x128xf32> to vector<16x128xf32>
    %35 = arith.addf %32, %34 : vector<16x128xf32>
    %36 = arith.addf %35, %0 : vector<16x128xf32>
    %37 = vector.extract_strided_slice %5 {offsets = [3, 0], sizes = [1, 128], strides = [1, 1]} : vector<8x128xf32> to vector<1x128xf32>
    %38 = vector.broadcast %37 : vector<1x128xf32> to vector<16x128xf32>
    %39 = arith.subf %36, %38 : vector<16x128xf32>
    %cst_12 = arith.constant 0.000000e+00 : f32
    %40 = vector.broadcast %cst_12 : f32 to vector<16x128xf32>
    %41 = arith.cmpf ogt, %39, %40 : vector<16x128xf32>
    %42 = vector.extract_strided_slice %5 {offsets = [4, 0], sizes = [1, 128], strides = [1, 1]} : vector<8x128xf32> to vector<1x128xf32>
    %43 = vector.broadcast %42 : vector<1x128xf32> to vector<16x128xf32>
    %44 = arith.mulf %43, %39 : vector<16x128xf32>
    %45 = arith.select %41, %39, %44 : vector<16x128xi1>, vector<16x128xf32>
    %46 = vector.extract_strided_slice %5 {offsets = [5, 0], sizes = [1, 128], strides = [1, 1]} : vector<8x128xf32> to vector<1x128xf32>
    %47 = vector.broadcast %46 : vector<1x128xf32> to vector<16x128xf32>
    %48 = arith.addf %45, %47 : vector<16x128xf32>
    %c0_13 = arith.constant 0 : index
    %c0_14 = arith.constant 0 : index
    %49 = vector.load %arg4[%c0_13, %c0_14] : memref<16x128xf32, #tpu.memory_space<vmem>>, vector<16x128xf32>
    tpu.vector_store %arg4[%c0_13, %c0_14], %48 {strides = array<i32>} : memref<16x128xf32, #tpu.memory_space<vmem>>, vector<16x128xf32>,
    %c1 = arith.constant 1 : index
    %c0_15 = arith.constant 0 : index
    %c0_16 = arith.constant 0 : index
    %50 = vector.load %arg3[%c1, %c0_15, %c0_16] : memref<3x8x128xf32, #tpu.memory_space<vmem>>, vector<1x8x128xf32>
    %51 = vector.shape_cast %50 : vector<1x8x128xf32> to vector<8x128xf32>
    %52 = vector.extract_strided_slice %3 {offsets = [0, 128], sizes = [16, 128], strides = [1, 1]} : vector<16x384xf32> to vector<16x128xf32>
    %53 = vector.extract_strided_slice %51 {offsets = [0, 0], sizes = [1, 128], strides = [1, 1]} : vector<8x128xf32> to vector<1x128xf32>
    %54 = vector.broadcast %53 : vector<1x128xf32> to vector<16x128xf32>
    %55 = arith.addf %52, %54 : vector<16x128xf32>
    %cst_17 = arith.constant dense<0.000000e+00> : vector<16xf32>
    %56 = vector.multi_reduction <add>, %55, %cst_17 [1] : vector<16x128xf32> to vector<16xf32>
    %57 = vector.shape_cast %56 : vector<16xf32> to vector<16x1xf32>
    %58 = arith.mulf %55, %55 : vector<16x128xf32>
    %cst_18 = arith.constant dense<0.000000e+00> : vector<16xf32>
    %59 = vector.multi_reduction <add>, %58, %cst_18 [1] : vector<16x128xf32> to vector<16xf32>
    %60 = vector.shape_cast %59 : vector<16xf32> to vector<16x1xf32>
    %cst_19 = arith.constant 3.125000e-02 : f32
    %61 = vector.broadcast %cst_19 : f32 to vector<16x1xf32>
    %62 = arith.mulf %57, %61 : vector<16x1xf32>
    %cst_20 = arith.constant 3.125000e-02 : f32
    %63 = vector.broadcast %cst_20 : f32 to vector<16x1xf32>
    %64 = arith.mulf %60, %63 : vector<16x1xf32>
    %65 = arith.mulf %62, %62 : vector<16x1xf32>
    %66 = arith.subf %64, %65 : vector<16x1xf32>
    %cst_21 = arith.constant 0.000000e+00 : f32
    %67 = vector.broadcast %cst_21 : f32 to vector<16x1xf32>
    %68 = arith.maximumf %66, %67 : vector<16x1xf32>
    %69 = vector.broadcast %62 : vector<16x1xf32> to vector<16x128xf32>
    %70 = arith.subf %55, %69 : vector<16x128xf32>
    %cst_22 = arith.constant 9.99999997E-7 : f32
    %71 = vector.broadcast %cst_22 : f32 to vector<16x1xf32>
    %72 = arith.addf %68, %71 : vector<16x1xf32>
    %73 = math.rsqrt %72 : vector<16x1xf32>
    %74 = vector.broadcast %73 : vector<16x1xf32> to vector<16x128xf32>
    %75 = arith.mulf %70, %74 : vector<16x128xf32>
    %76 = vector.extract_strided_slice %51 {offsets = [1, 0], sizes = [1, 128], strides = [1, 1]} : vector<8x128xf32> to vector<1x128xf32>
    %77 = vector.broadcast %76 : vector<1x128xf32> to vector<16x128xf32>
    %78 = arith.mulf %75, %77 : vector<16x128xf32>
    %79 = vector.extract_strided_slice %51 {offsets = [2, 0], sizes = [1, 128], strides = [1, 1]} : vector<8x128xf32> to vector<1x128xf32>
    %80 = vector.broadcast %79 : vector<1x128xf32> to vector<16x128xf32>
    %81 = arith.addf %78, %80 : vector<16x128xf32>
    %82 = arith.addf %81, %0 : vector<16x128xf32>
    %83 = vector.extract_strided_slice %51 {offsets = [3, 0], sizes = [1, 128], strides = [1, 1]} : vector<8x128xf32> to vector<1x128xf32>
    %84 = vector.broadcast %83 : vector<1x128xf32> to vector<16x128xf32>
    %85 = arith.subf %82, %84 : vector<16x128xf32>
    %cst_23 = arith.constant 0.000000e+00 : f32
    %86 = vector.broadcast %cst_23 : f32 to vector<16x128xf32>
    %87 = arith.cmpf ogt, %85, %86 : vector<16x128xf32>
    %88 = vector.extract_strided_slice %51 {offsets = [4, 0], sizes = [1, 128], strides = [1, 1]} : vector<8x128xf32> to vector<1x128xf32>
    %89 = vector.broadcast %88 : vector<1x128xf32> to vector<16x128xf32>
    %90 = arith.mulf %89, %85 : vector<16x128xf32>
    %91 = arith.select %87, %85, %90 : vector<16x128xi1>, vector<16x128xf32>
    %92 = vector.extract_strided_slice %51 {offsets = [5, 0], sizes = [1, 128], strides = [1, 1]} : vector<8x128xf32> to vector<1x128xf32>
    %93 = vector.broadcast %92 : vector<1x128xf32> to vector<16x128xf32>
    %94 = arith.addf %91, %93 : vector<16x128xf32>
    %c0_24 = arith.constant 0 : index
    %c0_25 = arith.constant 0 : index
    %95 = vector.load %arg5[%c0_24, %c0_25] : memref<16x128xf32, #tpu.memory_space<vmem>>, vector<16x128xf32>
    tpu.vector_store %arg5[%c0_24, %c0_25], %94 {strides = array<i32>} : memref<16x128xf32, #tpu.memory_space<vmem>>, vector<16x128xf32>,
    %c2 = arith.constant 2 : index
    %c0_26 = arith.constant 0 : index
    %c0_27 = arith.constant 0 : index
    %96 = vector.load %arg3[%c2, %c0_26, %c0_27] : memref<3x8x128xf32, #tpu.memory_space<vmem>>, vector<1x8x128xf32>
    %97 = vector.shape_cast %96 : vector<1x8x128xf32> to vector<8x128xf32>
    %98 = vector.extract_strided_slice %3 {offsets = [0, 256], sizes = [16, 128], strides = [1, 1]} : vector<16x384xf32> to vector<16x128xf32>
    %99 = vector.extract_strided_slice %97 {offsets = [0, 0], sizes = [1, 128], strides = [1, 1]} : vector<8x128xf32> to vector<1x128xf32>
    %100 = vector.broadcast %99 : vector<1x128xf32> to vector<16x128xf32>
    %101 = arith.addf %98, %100 : vector<16x128xf32>
    %cst_28 = arith.constant dense<0.000000e+00> : vector<16xf32>
    %102 = vector.multi_reduction <add>, %101, %cst_28 [1] : vector<16x128xf32> to vector<16xf32>
    %103 = vector.shape_cast %102 : vector<16xf32> to vector<16x1xf32>
    %104 = arith.mulf %101, %101 : vector<16x128xf32>
    %cst_29 = arith.constant dense<0.000000e+00> : vector<16xf32>
    %105 = vector.multi_reduction <add>, %104, %cst_29 [1] : vector<16x128xf32> to vector<16xf32>
    %106 = vector.shape_cast %105 : vector<16xf32> to vector<16x1xf32>
    %cst_30 = arith.constant 3.125000e-02 : f32
    %107 = vector.broadcast %cst_30 : f32 to vector<16x1xf32>
    %108 = arith.mulf %103, %107 : vector<16x1xf32>
    %cst_31 = arith.constant 3.125000e-02 : f32
    %109 = vector.broadcast %cst_31 : f32 to vector<16x1xf32>
    %110 = arith.mulf %106, %109 : vector<16x1xf32>
    %111 = arith.mulf %108, %108 : vector<16x1xf32>
    %112 = arith.subf %110, %111 : vector<16x1xf32>
    %cst_32 = arith.constant 0.000000e+00 : f32
    %113 = vector.broadcast %cst_32 : f32 to vector<16x1xf32>
    %114 = arith.maximumf %112, %113 : vector<16x1xf32>
    %115 = vector.broadcast %108 : vector<16x1xf32> to vector<16x128xf32>
    %116 = arith.subf %101, %115 : vector<16x128xf32>
    %cst_33 = arith.constant 9.99999997E-7 : f32
    %117 = vector.broadcast %cst_33 : f32 to vector<16x1xf32>
    %118 = arith.addf %114, %117 : vector<16x1xf32>
    %119 = math.rsqrt %118 : vector<16x1xf32>
    %120 = vector.broadcast %119 : vector<16x1xf32> to vector<16x128xf32>
    %121 = arith.mulf %116, %120 : vector<16x128xf32>
    %122 = vector.extract_strided_slice %97 {offsets = [1, 0], sizes = [1, 128], strides = [1, 1]} : vector<8x128xf32> to vector<1x128xf32>
    %123 = vector.broadcast %122 : vector<1x128xf32> to vector<16x128xf32>
    %124 = arith.mulf %121, %123 : vector<16x128xf32>
    %125 = vector.extract_strided_slice %97 {offsets = [2, 0], sizes = [1, 128], strides = [1, 1]} : vector<8x128xf32> to vector<1x128xf32>
    %126 = vector.broadcast %125 : vector<1x128xf32> to vector<16x128xf32>
    %127 = arith.addf %124, %126 : vector<16x128xf32>
    %128 = arith.addf %127, %0 : vector<16x128xf32>
    %129 = vector.extract_strided_slice %97 {offsets = [3, 0], sizes = [1, 128], strides = [1, 1]} : vector<8x128xf32> to vector<1x128xf32>
    %130 = vector.broadcast %129 : vector<1x128xf32> to vector<16x128xf32>
    %131 = arith.subf %128, %130 : vector<16x128xf32>
    %cst_34 = arith.constant 0.000000e+00 : f32
    %132 = vector.broadcast %cst_34 : f32 to vector<16x128xf32>
    %133 = arith.cmpf ogt, %131, %132 : vector<16x128xf32>
    %134 = vector.extract_strided_slice %97 {offsets = [4, 0], sizes = [1, 128], strides = [1, 1]} : vector<8x128xf32> to vector<1x128xf32>
    %135 = vector.broadcast %134 : vector<1x128xf32> to vector<16x128xf32>
    %136 = arith.mulf %135, %131 : vector<16x128xf32>
    %137 = arith.select %133, %131, %136 : vector<16x128xi1>, vector<16x128xf32>
    %138 = vector.extract_strided_slice %97 {offsets = [5, 0], sizes = [1, 128], strides = [1, 1]} : vector<8x128xf32> to vector<1x128xf32>
    %139 = vector.broadcast %138 : vector<1x128xf32> to vector<16x128xf32>
    %140 = arith.addf %137, %139 : vector<16x128xf32>
    %c0_35 = arith.constant 0 : index
    %c0_36 = arith.constant 0 : index
    %141 = vector.load %arg6[%c0_35, %c0_36] : memref<16x128xf32, #tpu.memory_space<vmem>>, vector<16x128xf32>
    tpu.vector_store %arg6[%c0_35, %c0_36], %140 {strides = array<i32>} : memref<16x128xf32, #tpu.memory_space<vmem>>, vector<16x128xf32>,
    return
  }
  func.func @transform_0(%arg0: i32) -> (i32, i32) {
    %c0_i32 = arith.constant 0 : i32
    %c0_i32_0 = arith.constant 0 : i32
    return %arg0, %c0_i32 : i32, i32
  }
  func.func @transform_1(%arg0: i32) -> (i32, i32) {
    %c0_i32 = arith.constant 0 : i32
    %c0_i32_0 = arith.constant 0 : i32
    %c0_i32_1 = arith.constant 0 : i32
    return %c0_i32, %c0_i32_0 : i32, i32
  }
  func.func @transform_2(%arg0: i32) -> (i32, i32, i32) {
    %c0_i32 = arith.constant 0 : i32
    %c0_i32_0 = arith.constant 0 : i32
    %c0_i32_1 = arith.constant 0 : i32
    %c0_i32_2 = arith.constant 0 : i32
    return %c0_i32, %c0_i32_0, %c0_i32_1 : i32, i32, i32
  }
  func.func @transform_3(%arg0: i32) -> (i32, i32) {
    %c0_i32 = arith.constant 0 : i32
    %c0_i32_0 = arith.constant 0 : i32
    return %arg0, %c0_i32 : i32, i32
  }
  func.func @transform_4(%arg0: i32) -> (i32, i32) {
    %c0_i32 = arith.constant 0 : i32
    %c0_i32_0 = arith.constant 0 : i32
    return %arg0, %c0_i32 : i32, i32
  }
  func.func @transform_5(%arg0: i32) -> (i32, i32) {
    %c0_i32 = arith.constant 0 : i32
    %c0_i32_0 = arith.constant 0 : i32
    return %arg0, %c0_i32 : i32, i32
  }
}

</mosaic_0001>

<bundles_post_ra>
// kernel: tpu_custom_call.1
= control target key start
LH: loop header
LB: loop body
LE: loop exit
PB: predicated region body
PF: predicated region fallthrough
CT: control target
= control target key end

     0   :  { %11 = vsyncpa [#allocation3], 0  ;;  %s1064_s0 = inlined_call_operand.hbm [shape: f32[16,128], index: 0, kind: input, shape index: {}]   ;;  %s1065_s1 = inlined_call_operand.hbm [shape: bf16[128,384], index: 1, kind: input, shape index: {}]   ;;  %s1066_s2 = inlined_call_operand.hbm [shape: f32[3,8,128], index: 2, kind: input, shape index: {}]   ;;  %s1067_s3 = inlined_call_operand.hbm [shape: f32[16,128], index: 3, kind: output, shape index: {0}]   ;;  %s1068_s4 = inlined_call_operand.hbm [shape: f32[16,128], index: 4, kind: output, shape index: {1}]   ;;  %s1069_s5 = inlined_call_operand.hbm [shape: f32[16,128], index: 5, kind: output, shape index: {2}]  }
   0x1   :  { %12 = vsyncpa [#allocation6], 0 }
   0x2   :  { %13 = vsyncpa [#allocation4], 0 }
   0x3   :  { %14 = vsyncpa [#allocation10], 0  ;;  %s828_s18 = smov [#allocation5]   ;;  %s688_s22 = scalar_lea.hbm %s1065_s1, 3072 }
   0x4   :  { %s32_s19 = sshll.u32 %s828_s18, 4  ;;  %p689_p0 = scmp.ne.s32.totalorder %s1065_s1, %s688_s22  ;;  %s33_s19 = int_to_ptr.vmem [resolvable:$true] %s32_s19 }
   0x5   :  { %p692_p1 = scmp.lt.u32.totalorder %s688_s22, %s1065_s1 }
   0x7   :  { %p694_p2 = pnand %p692_p1, %p689_p0 }
   0x9   :  { %697 = shalt.err (!%p694_p2)
}
   0xa   :  { %s698_s27 = scalar_lea.vmem %s33_s19, 3072  ;;  %p703_p4 = scmp.lt.s32.totalorder %s33_s19, %s33_s19 }
   0xb   :  { %p699_p3 = scmp.ne.s32.totalorder %s33_s19, %s698_s27  ;;  %p704_p5 = scmp.lt.s32.totalorder %s698_s27, %s698_s27 }
   0xd   :  { %p705_p6 = por %p704_p5, %p703_p4 }
   0xf   :  { %p706_p7 = pnand %p705_p6, %p699_p3 }
  0x11   :  { %709 = shalt.err (!%p706_p7)
}
  0x12   :  { %s829_s28 = smov 192   ;;  %s830_s29 = smov 12  }
  0x13   :  { %38 = dma.hbm_to_vmem [thread:$0]  %s1065_s1, 3072, %s33_s19, [#allocation6], %s829_s28, %s829_s28, %s830_s29  }
  0x14   :  { %s831_s7 = smov [#allocation2]   ;;  %s710_s11 = scalar_lea.hbm %s1064_s0, 256 }
  0x15   :  { %s20_s8 = sshll.u32 %s831_s7, 4  ;;  %p711_p8 = scmp.ne.s32.totalorder %s1064_s0, %s710_s11  ;;  %s21_s8 = int_to_ptr.vmem [resolvable:$true] %s20_s8 }
  0x16   :  { %p714_p9 = scmp.lt.u32.totalorder %s710_s11, %s1064_s0 }
  0x18   :  { %p716_p10 = pnand %p714_p9, %p711_p8 }
  0x1a   :  { %719 = shalt.err (!%p716_p10)
}
  0x1b   :  { %s720_s16 = scalar_lea.vmem %s21_s8, 256  ;;  %p725_p12 = scmp.lt.s32.totalorder %s21_s8, %s21_s8 }
  0x1c   :  { %p721_p11 = scmp.ne.s32.totalorder %s21_s8, %s720_s16  ;;  %p726_p13 = scmp.lt.s32.totalorder %s720_s16, %s720_s16 }
  0x1e   :  { %p727_p0 = por %p726_p13, %p725_p12 }
  0x20   :  { %p728_p1 = pnand %p727_p0, %p721_p11 }
  0x22   :  { %731 = shalt.err (!%p728_p1)
}
  0x23   :  { %s832_s1 = smov 128   ;;  %s833_s17 = smov 8  }
  0x24   :  { %26 = dma.hbm_to_vmem [thread:$0]  %s1064_s0, 256, %s21_s8, [#allocation3], %s832_s1, %s832_s1, %s833_s17  }
  0x25   :  { %s834_s20 = smov [#allocation7]   ;;  %s732_s24 = scalar_lea.hbm %s1066_s2, 384 }
  0x26   :  { %s44_s21 = sshll.u32 %s834_s20, 4  ;;  %p733_p2 = scmp.ne.s32.totalorder %s1066_s2, %s732_s24  ;;  %s45_s21 = int_to_ptr.vmem [resolvable:$true] %s44_s21 }
  0x27   :  { %p736_p3 = scmp.lt.u32.totalorder %s732_s24, %s1066_s2 }
  0x29   :  { %p738_p4 = pnand %p736_p3, %p733_p2 }
  0x2b   :  { %741 = shalt.err (!%p738_p4)
}
  0x2c   :  { %s742_s29 = scalar_lea.vmem %s45_s21, 384  ;;  %p747_p6 = scmp.lt.s32.totalorder %s45_s21, %s45_s21 }
  0x2d   :  { %p743_p5 = scmp.ne.s32.totalorder %s45_s21, %s742_s29  ;;  %p748_p7 = scmp.lt.s32.totalorder %s742_s29, %s742_s29 }
  0x2f   :  { %p749_p8 = por %p748_p7, %p747_p6 }
  0x31   :  { %p750_p9 = pnand %p749_p8, %p743_p5 }
  0x33   :  { %753 = shalt.err (!%p750_p9)
}
  0x34   :  { %50 = dma.hbm_to_vmem [thread:$0]  %s1066_s2, 384, %s45_s21, [#allocation6], %s832_s1, %s832_s1, %s833_s17  }
  0x35   :  { %820 = dma.done.wait [#allocation3], 256  }
  0x36   :  { %821 = vsyncadd [#allocation3], 4294967040 }
  0x37   :  { %822 = dma.done.wait [#allocation6], 3456  }
  0x38   :  { %823 = vsyncadd [#allocation6], 4294963840  ;;  %v835_v0 = vmov 0.0   ;;  %vm836_vm0 = vmmov 0   ;;  %v837_v1 = vmov 0   ;;  %v913_v25 = vld [vmem:[#allocation2] sm:$0xff]  ;;  %v309_v29 = vlaneseq }
  0x39   :  { %611 = vmatprep.subr.bf16.mxu1 %v835_v0  ;;  %627 = vmatprep.mubr.msk.bf16.mxu1 %vm836_vm0, %v835_v0  ;;  %v644_v2 = vld [vmem:[#allocation5 + $0x4] ss:$12 sps:$4 sm:$0xff]   ;;  %v646_v3 = vld [vmem:[#allocation5 + $0x8] ss:$12 sps:$4 sm:$0xff]   ;;  %v647_v4 = vld [vmem:[#allocation5] ss:$12 sps:$4 sm:$0xff]  }
  0x3a   :  { %256 = vmatprep.mubr.bf16.mxu0 %v837_v1  ;;  %224 = vmatprep.subr.bf16.mxu0 %v644_v2  ;;  %v648_v5 = vld [vmem:[#allocation5 + $0x1c] ss:$12 sps:$4 sm:$0xff]   ;;  %v650_v6 = vld [vmem:[#allocation5 + $0x20] ss:$12 sps:$4 sm:$0xff]   ;;  %v651_v7 = vld [vmem:[#allocation5 + $0x18] ss:$12 sps:$4 sm:$0xff]  }
  0x3b   :  { %612 = vmatpush3.bf16.msra.mxu1 %v646_v3  ;;  %225 = vmatpush1.bf16.msra.mxu0 %v647_v4  ;;  %v652_v8 = vld [vmem:[#allocation5 + $0x34] ss:$12 sps:$4 sm:$0xff]   ;;  %v654_v9 = vld [vmem:[#allocation5 + $0x38] ss:$12 sps:$4 sm:$0xff]   ;;  %v655_v10 = vld [vmem:[#allocation5 + $0x30] ss:$12 sps:$4 sm:$0xff]  }
  0x3c   :  { %613 = vmatprep.subr.bf16.mxu1 %v835_v0  ;;  %226 = vmatprep.subr.bf16.mxu0 %v648_v5  ;;  %v656_v11 = vld [vmem:[#allocation5 + $0x4c] ss:$12 sps:$4 sm:$0xff]   ;;  %v658_v12 = vld [vmem:[#allocation5 + $0x50] ss:$12 sps:$4 sm:$0xff]   ;;  %v659_v13 = vld [vmem:[#allocation5 + $0x48] ss:$12 sps:$4 sm:$0xff]  }
  0x3d   :  { %v660_v14 = vld [vmem:[#allocation5 + $0x64] ss:$12 sps:$4 sm:$0xff]   ;;  %v662_v15 = vld [vmem:[#allocation5 + $0x68] ss:$12 sps:$4 sm:$0xff]   ;;  %v663_v16 = vld [vmem:[#allocation5 + $0x60] ss:$12 sps:$4 sm:$0xff]  }
  0x3e   :  { %v664_v17 = vld [vmem:[#allocation5 + $0x7c] ss:$12 sps:$4 sm:$0xff]   ;;  %v666_v18 = vld [vmem:[#allocation5 + $0x80] ss:$12 sps:$4 sm:$0xff]   ;;  %v667_v19 = vld [vmem:[#allocation5 + $0x78] ss:$12 sps:$4 sm:$0xff]  }
  0x3f   :  { %614 = vmatpush3.bf16.msra.mxu1 %v650_v6  ;;  %227 = vmatpush1.bf16.msra.mxu0 %v651_v7  ;;  %v668_v20 = vld [vmem:[#allocation5 + $0x94] ss:$12 sps:$4 sm:$0xff]   ;;  %v670_v21 = vld [vmem:[#allocation5 + $0x98] ss:$12 sps:$4 sm:$0xff]   ;;  %v671_v22 = vld [vmem:[#allocation5 + $0x90] ss:$12 sps:$4 sm:$0xff]  }
  0x40   :  { %615 = vmatprep.subr.bf16.mxu1 %v835_v0  ;;  %228 = vmatprep.subr.bf16.mxu0 %v652_v8  ;;  %v672_v23 = vld [vmem:[#allocation5 + $0xac] ss:$12 sps:$4 sm:$0xff]   ;;  %v674_v24 = vld [vmem:[#allocation5 + $0xb0] ss:$12 sps:$4 sm:$0xff]   ;;  %v675_v27 = vld [vmem:[#allocation5 + $0xa8] ss:$12 sps:$4 sm:$0xff]  }
  0x41   :  { %v915_v26 = vld [vmem:[#allocation2 + $0x8] sm:$0xff]  ;;  %v919_v30 = vshrl.u32 %v309_v29, 7  ;;  %v922_v32 = vld [vmem:[#allocation7 + $0x10] sm:$0xff]  ;;  %v924_v33 = vld [vmem:[#allocation7] sm:$0xff]  ;;  %s838_s2 = smov [#allocation8]   ;;  %s839_s7 = smov [#allocation9]  }
  0x42   :  { %v63_v28 = vpack.c.bf16 %v915_v26, %v913_v25  ;;  %v928_v36 = vld [vmem:[#allocation7 + $0x8] sm:$0xff]  ;;  %s534_s6 = sshll.u32 %s838_s2, 4  ;;  %s546_s8 = sshll.u32 %s839_s7, 4  ;;  %s535_s6 = int_to_ptr.vmem [resolvable:$true] %s534_s6  ;;  %s547_s8 = int_to_ptr.vmem [resolvable:$true] %s546_s8 }
  0x43   :  { %616 = vmatpush3.bf16.msra.mxu1 %v654_v9  ;;  %229 = vmatpush1.bf16.msra.mxu0 %v655_v10  ;;  %v311_v31 = vsub.s32 0, %v919_v30  ;;  %s754_s9 = scalar_lea.vmem %s535_s6, 256  ;;  %p759_p11 = scmp.lt.s32.totalorder %s535_s6, %s535_s6 }
  0x44   :  { %617 = vmatprep.subr.bf16.mxu1 %v835_v0  ;;  %230 = vmatprep.subr.bf16.mxu0 %v656_v11  ;;  %p755_p10 = scmp.ne.s32.totalorder %s535_s6, %s754_s9  ;;  %p760_p12 = scmp.lt.s32.totalorder %s754_s9, %s754_s9 }
  0x45   :  { %v460_v34 = vrot.slane %v922_v32, %v311_v31  ;;  %v312_v35 = vrot.slane %v924_v33, %v311_v31  ;;  %v386_v41 = vrot.slane %v928_v36, %v311_v31 }
  0x46   :  { %p761_p13 = por %p760_p12, %p759_p11 }
  0x47   :  { %618 = vmatpush3.bf16.msra.mxu1 %v658_v12  ;;  %231 = vmatpush1.bf16.msra.mxu0 %v659_v13 }
  0x48   :  { %619 = vmatprep.subr.bf16.mxu1 %v835_v0  ;;  %232 = vmatprep.subr.bf16.mxu0 %v660_v14  ;;  %p762_p0 = pnand %p761_p13, %p755_p10 }
  0x4b   :  { %620 = vmatpush3.bf16.msra.mxu1 %v662_v15  ;;  %233 = vmatpush1.bf16.msra.mxu0 %v663_v16 }
  0x4c   :  { %621 = vmatprep.subr.bf16.mxu1 %v835_v0  ;;  %234 = vmatprep.subr.bf16.mxu0 %v664_v17 }
  0x4f   :  { %622 = vmatpush3.bf16.msra.mxu1 %v666_v18  ;;  %235 = vmatpush1.bf16.msra.mxu0 %v667_v19 }
  0x50   :  { %623 = vmatprep.subr.bf16.mxu1 %v835_v0  ;;  %236 = vmatprep.subr.bf16.mxu0 %v668_v20 }
  0x53   :  { %624 = vmatpush3.bf16.msra.mxu1 %v670_v21  ;;  %237 = vmatpush1.bf16.msra.mxu0 %v671_v22 }
  0x54   :  { %625 = vmatprep.subr.bf16.mxu1 %v835_v0  ;;  %238 = vmatprep.subr.bf16.mxu0 %v672_v23 }
  0x57   :  { %626 = vmatpush3.bf16.msra.mxu1 %v674_v24  ;;  %239 = vmatpush1.bf16.msra.mxu0 %v675_v27 }
  0x5a   :  { %628 = vmatmul.mubr.bf16.vlgmr.msra.gmra.mrb[0].mxu1 %v63_v28  ;;  %257 = vmatmul.mubr.bf16.vlgmr.msra.gmra.mrb[0].mxu0 %v63_v28 }
 0x12d   :  { %v301_v37 = vpop.f32.mrb[0].mxu1  ;;  %v258_v39 = vpop.f32.mrb[0].mxu0 }
 0x12e   :  { %v930_v38 = vadd.f32 %v460_v34, %v301_v37  ;;  %v629_v40 = vpop.f32.mrb[1].mxu1  ;;  %v933_v42 = vadd.f32 %v312_v35, %v258_v39  ;;  %v260_v43 = vpop.f32.mrb[1].mxu0 }
 0x12f   :  { %v304_v44 = vpop.f32.mrb[2].mxu1  ;;  %v262_v45 = vpop.f32.mrb[2].mxu0  ;;  %v937_v48 = vadd.f32 %v386_v41, %v260_v43 }
 0x130   :  { %463 = vadd.xlane.f32.xlu0 %v930_v38  ;;  %v630_v46 = vpop.f32.mrb[3].mxu1  ;;  %315 = vadd.xlane.f32.xlu1 %v933_v42  ;;  %v264_v47 = vpop.f32.mrb[3].mxu0  ;;  %v939_v49 = vadd.f32 %v460_v34, %v304_v44  ;;  %v319_v50 = vmul.f32 %v933_v42, %v933_v42  ;;  %v945_v51 = vadd.f32 %v312_v35, %v262_v45  ;;  %v345_v34 = vsub.s32 1, %v919_v30 }
 0x131   :  { %v948_v52 = vadd.f32 %v386_v41, %v264_v47  ;;  %v393_v54 = vmul.f32 %v937_v48, %v937_v48  ;;  %v467_v56 = vmul.f32 %v930_v38, %v930_v38  ;;  %v351_v47 = vsub.s32 2, %v919_v30 }
 0x132   :  { %v320_v53 = vmul.f32 %v945_v51, %v945_v51  ;;  %v468_v57 = vmul.f32 %v939_v49, %v939_v49 }
 0x133   :  { %v394_v55 = vmul.f32 %v948_v52, %v948_v52 }
 0x134   :  { %389 = vadd.xlane.f32.xlu0 %v937_v48  ;;  %465 = vadd.xlane.f32.xlu1 %v939_v49 }
 0x138   :  { %321 = vadd.xlane.f32.xlu0 %v319_v50  ;;  %317 = vadd.xlane.f32.xlu1 %v945_v51 }
 0x13c   :  { %391 = vadd.xlane.f32.xlu0 %v948_v52  ;;  %323 = vadd.xlane.f32.xlu1 %v320_v53 }
 0x140   :  { %395 = vadd.xlane.f32.xlu0 %v393_v54  ;;  %397 = vadd.xlane.f32.xlu1 %v394_v55  ;;  %v346_v55 = vrot.slane %v924_v33, %v345_v34 }
 0x144   :  { %469 = vadd.xlane.f32.xlu0 %v467_v56  ;;  %471 = vadd.xlane.f32.xlu1 %v468_v57 }
 0x1bd   :  { %v464_v58 = vpop.xlane.xlu0 %463  ;;  %v316_v59 = vpop.xlane.xlu1 %315 }
 0x1be   :  { %v325_v61 = vmul.f32 0.03125, %v316_v59  ;;  %v965_v15 = vmul.f32 0.03125, %v464_v58 }
 0x1c0   :  { %v329_v0 = vmul.f32 %v325_v61, %v325_v61  ;;  %v477_v29 = vmul.f32 %v965_v15, %v965_v15  ;;  %v335_v53 = vsub.f32 %v933_v42, %v325_v61 }
 0x1c1   :  { %v390_v60 = vpop.xlane.xlu0 %389  ;;  %v466_v62 = vpop.xlane.xlu1 %465 }
 0x1c2   :  { %v961_v6 = vmul.f32 0.03125, %v390_v60  ;;  %v969_v19 = vmul.f32 0.03125, %v466_v62  ;;  %v359_v60 = vsub.s32 3, %v919_v30  ;;  %v352_v62 = vrot.slane %v924_v33, %v351_v47 }
 0x1c4   :  { %v403_v16 = vmul.f32 %v961_v6, %v961_v6  ;;  %v478_v39 = vmul.f32 %v969_v19, %v969_v19 }
 0x1c5   :  { %v322_v63 = vpop.xlane.xlu0 %321  ;;  %v318_v2 = vpop.xlane.xlu1 %317 }
 0x1c6   :  { %v327_v1 = vmul.f32 0.03125, %v322_v63  ;;  %v326_v3 = vmul.f32 0.03125, %v318_v2  ;;  %v367_v63 = vsub.s32 4, %v919_v30  ;;  %v360_v2 = vrot.slane %v924_v33, %v359_v60 }
 0x1c8   :  { %v331_v4 = vsub.f32 %v327_v1, %v329_v0  ;;  %v330_v9 = vmul.f32 %v326_v3, %v326_v3  ;;  %v336_v1 = vsub.f32 %v945_v51, %v326_v3 }
 0x1c9   :  { %v392_v5 = vpop.xlane.xlu0 %391  ;;  %v324_v8 = vpop.xlane.xlu1 %323 }
 0x1ca   :  { %v333_v7 = vmax.f32 %v331_v4, 0.0  ;;  %v963_v10 = vmul.f32 0.03125, %v392_v5  ;;  %v328_v11 = vmul.f32 0.03125, %v324_v8  ;;  %v987_v5 = vsub.s32 5, %v919_v30 }
 0x1cb   :  { %v420_v8 = vrot.slane %v928_v36, %v345_v34 }
 0x1cc   :  { %v337_v12 = vadd.f32 1e-06, %v333_v7  ;;  %v332_v13 = vsub.f32 %v328_v11, %v330_v9  ;;  %v404_v20 = vmul.f32 %v963_v10, %v963_v10  ;;  %v409_v7 = vsub.f32 %v937_v48, %v961_v6 }
 0x1cd   :  { %v396_v14 = vpop.xlane.xlu0 %395  ;;  %v398_v18 = vpop.xlane.xlu1 %397  ;;  %v368_v11 = vrot.slane %v924_v33, %v367_v63  ;;  %v410_v51 = vsub.f32 %v948_v52, %v963_v10  ;;  %v376_v6 = vrot.slane %v924_v33, %v987_v5  ;;  %v484_v10 = vsub.f32 %v939_v49, %v969_v19 }
 0x1ce   :  { %676 = vrsqrt.f32 %v337_v12  ;;  %v401_v17 = vmul.f32 0.03125, %v396_v14  ;;  %v334_v21 = vmax.f32 %v332_v13, 0.0  ;;  %v402_v22 = vmul.f32 0.03125, %v398_v18 }
 0x1cf   :  { %v494_v18 = vrot.slane %v922_v32, %v345_v34  ;;  %v500_v33 = vrot.slane %v922_v32, %v351_v47  ;;  %v442_v49 = vrot.slane %v928_v36, %v367_v63 }
 0x1d0   :  { %v405_v23 = vsub.f32 %v401_v17, %v403_v16  ;;  %v338_v24 = vadd.f32 1e-06, %v334_v21  ;;  %v406_v27 = vsub.f32 %v402_v22, %v404_v20  ;;  %v426_v16 = vrot.slane %v928_v36, %v351_v47 }
 0x1d1   :  { %v470_v28 = vpop.xlane.xlu0 %469  ;;  %v472_v37 = vpop.xlane.xlu1 %471  ;;  %v483_v20 = vsub.f32 %v930_v38, %v965_v15  ;;  %v508_v47 = vrot.slane %v922_v32, %v359_v60 }
 0x1d2   :  { %v407_v31 = vmax.f32 %v405_v23, 0.0  ;;  %v475_v35 = vmul.f32 0.03125, %v470_v28  ;;  %678 = vrsqrt.f32 %v338_v24  ;;  %v408_v40 = vmax.f32 %v406_v27, 0.0 }
 0x1d3   :  { %v476_v41 = vmul.f32 0.03125, %v472_v37  ;;  %v434_v24 = vrot.slane %v928_v36, %v359_v60 }
 0x1d4   :  { %v411_v43 = vadd.f32 1e-06, %v407_v31  ;;  %v479_v44 = vsub.f32 %v475_v35, %v477_v29  ;;  %v412_v45 = vadd.f32 1e-06, %v408_v40 }
 0x1d5   :  { %v480_v46 = vsub.f32 %v476_v41, %v478_v39 }
 0x1d6   :  { %680 = vrsqrt.f32 %v411_v43  ;;  %v481_v50 = vmax.f32 %v479_v44, 0.0 }
 0x1d7   :  { %682 = vrsqrt.f32 %v412_v45  ;;  %v482_v54 = vmax.f32 %v480_v46, 0.0  ;;  %v450_v45 = vrot.slane %v928_v36, %v987_v5 }
 0x1d8   :  { %v677_v56 = vpop.eup %676  ;;  %v485_v57 = vadd.f32 1e-06, %v481_v50 }
 0x1d9   :  { %v341_v58 = vmul.f32 %v677_v56, %v335_v53  ;;  %v486_v59 = vadd.f32 1e-06, %v482_v54 }
 0x1da   :  { %684 = vrsqrt.f32 %v485_v57 }
 0x1db   :  { %686 = vrsqrt.f32 %v486_v59  ;;  %v347_v0 = vmul.f32 %v346_v55, %v341_v58 }
 0x1dc   :  { %v679_v42 = vpop.eup %678 }
 0x1dd   :  { %v353_v61 = vadd.f32 %v352_v62, %v347_v0  ;;  %v342_v4 = vmul.f32 %v679_v42, %v336_v1 }
 0x1df   :  { %v355_v9 = vadd.f32 %v353_v61, %v913_v25  ;;  %v348_v3 = vmul.f32 %v346_v55, %v342_v4  ;;  %v516_v55 = vrot.slane %v922_v32, %v367_v63 }
 0x1e0   :  { %v681_v12 = vpop.eup %680 }
 0x1e1   :  { %v683_v13 = vpop.eup %682  ;;  %v415_v14 = vmul.f32 %v681_v12, %v409_v7  ;;  %v361_v30 = vsub.f32 %v355_v9, %v360_v2  ;;  %v354_v48 = vadd.f32 %v352_v62, %v348_v3 }
 0x1e2   :  { %v416_v17 = vmul.f32 %v683_v13, %v410_v51 }
 0x1e3   :  { %v421_v21 = vmul.f32 %v420_v8, %v415_v14  ;;  %vm363_vm1 = vcmp.gt.f32.partialorder %v361_v30, 0.0  ;;  %v369_v22 = vmul.f32 %v368_v11, %v361_v30  ;;  %v356_v27 = vadd.f32 %v354_v48, %v915_v26 }
 0x1e4   :  { %v685_v52 = vpop.eup %684  ;;  %v422_v23 = vmul.f32 %v420_v8, %v416_v17 }
 0x1e5   :  { %v687_v28 = vpop.eup %686  ;;  %v489_v29 = vmul.f32 %v685_v52, %v483_v20  ;;  %v427_v31 = vadd.f32 %v426_v16, %v421_v21  ;;  %v371_v34 = vsel %vm363_vm1, %v361_v30, %v369_v22  ;;  %v362_v15 = vsub.f32 %v356_v27, %v360_v2 }
 0x1e6   :  { %v490_v35 = vmul.f32 %v687_v28, %v484_v10  ;;  %v428_v38 = vadd.f32 %v426_v16, %v422_v23  ;;  %v377_v37 = vadd.f32 %v376_v6, %v371_v34 }
 0x1e7   :  { %v495_v39 = vmul.f32 %v494_v18, %v489_v29  ;;  %v429_v40 = vadd.f32 %v427_v31, %v913_v25  ;;  %vm364_vm2 = vcmp.gt.f32.partialorder %v362_v15, 0.0  ;;  %v370_v43 = vmul.f32 %v368_v11, %v362_v15 }
 0x1e8   :  { %v496_v19 = vmul.f32 %v494_v18, %v490_v35  ;;  %v430_v41 = vadd.f32 %v428_v38, %v915_v26  ;;  %379 = vst [vmem:[#allocation8] sm:$0xff] %v377_v37 }
 0x1e9   :  { %v435_v44 = vsub.f32 %v429_v40, %v434_v24  ;;  %v501_v46 = vadd.f32 %v500_v33, %v495_v39  ;;  %v372_v53 = vsel %vm364_vm2, %v362_v15, %v370_v43 }
 0x1ea   :  { %v436_v50 = vsub.f32 %v430_v41, %v434_v24  ;;  %v502_v54 = vadd.f32 %v500_v33, %v496_v19  ;;  %v378_v57 = vadd.f32 %v376_v6, %v372_v53 }
 0x1eb   :  { %vm437_vm3 = vcmp.gt.f32.partialorder %v435_v44, 0.0  ;;  %v443_v56 = vmul.f32 %v442_v49, %v435_v44  ;;  %v503_v58 = vadd.f32 %v501_v46, %v913_v25 }
 0x1ec   :  { %vm438_vm4 = vcmp.gt.f32.partialorder %v436_v50, 0.0  ;;  %v444_v59 = vmul.f32 %v442_v49, %v436_v50  ;;  %v504_v36 = vadd.f32 %v502_v54, %v915_v26  ;;  %380 = vst [vmem:[#allocation8 + $0x8] sm:$0xff] %v378_v57 }
 0x1ed   :  { %v445_v62 = vsel %vm437_vm3, %v435_v44, %v443_v56  ;;  %v509_v60 = vsub.f32 %v503_v58, %v508_v47 }
 0x1ee   :  { %v446_v0 = vsel %vm438_vm4, %v436_v50, %v444_v59  ;;  %v451_v1 = vadd.f32 %v450_v45, %v445_v62 }
 0x1ef   :  { %765 = shalt.err (!%p762_p0)
}
 0x1f0   :  { %s766_s12 = scalar_lea.hbm %s1067_s3, 256 }
 0x1f1   :  { %p767_p1 = scmp.ne.s32.totalorder %s1067_s3, %s766_s12  ;;  %p770_p2 = scmp.lt.u32.totalorder %s766_s12, %s1067_s3 }
 0x1f3   :  { %p772_p3 = pnand %p770_p2, %p767_p1 }
 0x1f5   :  { %775 = shalt.err (!%p772_p3)
}
 0x1f6   :  { %540 = dma.vmem_to_hbm [thread:$0]  %s535_s6, 256, %s1067_s3, [#allocation4], %s832_s1, %s832_s1, %s833_s17   ;;  %v510_v25 = vsub.f32 %v504_v36, %v508_v47  ;;  %v524_v26 = vrot.slane %v922_v32, %v987_v5  ;;  %v452_v63 = vadd.f32 %v450_v45, %v446_v0  ;;  %vm511_vm5 = vcmp.gt.f32.partialorder %v509_v60, 0.0  ;;  %453 = vst [vmem:[#allocation9] sm:$0xff] %v451_v1 }
 0x1f7   :  { %v517_v42 = vmul.f32 %v516_v55, %v509_v60  ;;  %s840_s20 = smov [#allocation11]   ;;  %s776_s22 = scalar_lea.vmem %s547_s8, 256 }
 0x1f8   :  { %vm512_vm6 = vcmp.gt.f32.partialorder %v510_v25, 0.0  ;;  %v518_v61 = vmul.f32 %v516_v55, %v510_v25  ;;  %s558_s21 = sshll.u32 %s840_s20, 4  ;;  %454 = vst [vmem:[#allocation9 + $0x8] sm:$0xff] %v452_v63  ;;  %p777_p4 = scmp.ne.s32.totalorder %s547_s8, %s776_s22  ;;  %s559_s21 = int_to_ptr.vmem [resolvable:$true] %s558_s21 }
 0x1f9   :  { %v519_v2 = vsel %vm511_vm5, %v509_v60, %v517_v42  ;;  %p781_p5 = scmp.lt.s32.totalorder %s547_s8, %s547_s8  ;;  %p782_p6 = scmp.lt.s32.totalorder %s776_s22, %s776_s22 }
 0x1fb   :  { %p783_p7 = por %p782_p6, %p781_p5 }
 0x1fd   :  { %p784_p8 = pnand %p783_p7, %p777_p4 }
 0x1ff   :  { %787 = shalt.err (!%p784_p8)
}
 0x200   :  { %s788_s24 = scalar_lea.hbm %s1068_s4, 256 }
 0x201   :  { %p789_p9 = scmp.ne.s32.totalorder %s1068_s4, %s788_s24  ;;  %p792_p10 = scmp.lt.u32.totalorder %s788_s24, %s1068_s4 }
 0x203   :  { %p794_p11 = pnand %p792_p10, %p789_p9 }
 0x205   :  { %797 = shalt.err (!%p794_p11)
}
 0x206   :  { %552 = dma.vmem_to_hbm [thread:$0]  %s547_s8, 256, %s1068_s4, [#allocation10], %s832_s1, %s832_s1, %s833_s17   ;;  %v520_v32 = vsel %vm512_vm6, %v510_v25, %v518_v61  ;;  %v525_v4 = vadd.f32 %v524_v26, %v519_v2 }
 0x207   :  { %v526_v5 = vadd.f32 %v524_v26, %v520_v32  ;;  %s798_s30 = scalar_lea.vmem %s559_s21, 256  ;;  %p803_p13 = scmp.lt.s32.totalorder %s559_s21, %s559_s21 }
 0x208   :  { %527 = vst [vmem:[#allocation11] sm:$0xff] %v525_v4  ;;  %p799_p12 = scmp.ne.s32.totalorder %s559_s21, %s798_s30  ;;  %p804_p0 = scmp.lt.s32.totalorder %s798_s30, %s798_s30 }
 0x209   :  { %528 = vst [vmem:[#allocation11 + $0x8] sm:$0xff] %v526_v5 }
 0x20a   :  { %p805_p1 = por %p804_p0, %p803_p13 }
 0x20c   :  { %p806_p2 = pnand %p805_p1, %p799_p12 }
 0x20e   :  { %809 = shalt.err (!%p806_p2)
}
 0x20f   :  { %s810_s7 = scalar_lea.hbm %s1069_s5, 256 }
 0x210   :  { %p811_p3 = scmp.ne.s32.totalorder %s1069_s5, %s810_s7  ;;  %p814_p4 = scmp.lt.u32.totalorder %s810_s7, %s1069_s5 }
 0x212   :  { %p816_p5 = pnand %p814_p4, %p811_p3 }
 0x214   :  { %819 = shalt.err (!%p816_p5)
}
 0x215   :  { %564 = dma.vmem_to_hbm [thread:$0]  %s559_s21, 256, %s1069_s5, [#allocation10], %s832_s1, %s832_s1, %s833_s17  }
 0x216   :  { %824 = dma.done.wait [#allocation4], 256  }
 0x217   :  { %825 = vsyncadd [#allocation4], 4294967040 }
 0x218   :  { %826 = dma.done.wait [#allocation10], 512  }
 0x219   :  { %827 = vsyncadd [#allocation10], 4294966784 }
 0x21a   :  { %574 = vsyncpa [#allocation3], 1 }
 0x21b   :  { %575 = vsyncpa [#allocation6], 1 }
 0x21c   :  { %576 = vsyncpa [#allocation4], 1 }
 0x21d   :  { %577 = vsyncpa [#allocation10], 1 }

</bundles_post_ra>
